<compile_context>
chip_gen: v7x
topology: tpu7x:2x2x1
jax: 0.10.0
libtpu: 0.0.40
codegen_flags: <defaults>
</compile_context>

<pallas_src>
import functools
import math

import numpy as np
import jax
import jax.numpy as jnp
from jax.experimental import pallas as pl
from jax.experimental.pallas import tpu as pltpu

_TILE_BYTES = 4 * 1024 * 1024  # per-tile target; double-buffered in+out ~= 4x this.


def _round_down(x, m):
    return (x // m) * m


def _round_up(x, m):
    return -(-x // m) * m


def _choose_tiles(rows, cols, itemsize, row_align, tile_bytes):
    """Pick (block_rows, block_lanes) for a (rows, cols) view under a byte budget."""
    rows_min = min(rows, max(row_align, 8))

    # Lane (last-dim) block: full extent when it fits the budget / is small,
    # otherwise a large multiple of 128 (preferring one that divides cols so every
    # lane block is unmasked and equal-sized).
    if cols <= 1024 or cols * itemsize * rows_min <= tile_bytes:
        bl = cols
    else:
        max_bl = tile_bytes // (rows_min * itemsize)
        bl = max(128, _round_down(min(cols, max_bl), 128))
        for cand in range(bl, max(128, (3 * bl) // 4) - 1, -128):
            if cols % cand == 0:
                bl = cand
                break

    # Sublane (row) block: fill the byte budget, keeping it a multiple of row_align
    # (itself a multiple of 8) or the full row extent.
    br_budget = max(1, tile_bytes // (bl * itemsize))
    if rows <= br_budget or rows <= max(row_align, 8):
        br = rows
    else:
        br = min(rows, max(row_align, _round_down(br_budget, row_align)))

    # Guarantee >= 2 grid steps so both v7x TensorCores get work (when possible
    # without violating the (8, 128) block constraints).
    if -(-rows // br) * -(-cols // bl) < 2:
        if cols >= 256 and bl == cols:
            half = _round_down(-(-cols // 2), 128)
            if half >= 128:
                bl = half
        elif rows >= 16 and br == rows:
            br = _round_down(-(-rows // 2), 8)
    return br, bl


def _mean_shift_kernel(x_ref, o_ref, *, shift, period, block_rows, static_bias):
    """Add a per-channel constant. channel(row) = ((global_row) // period) % C.

    shift: tuple of Python floats (static). If static_bias, the channel pattern is
    identical for every row block, so the iota/mod/select chain is program_id-free
    and constant-folds; otherwise the global row offset is added.
    """
    num_ch = len(shift)
    r = jax.lax.broadcasted_iota(jnp.int32, (block_rows, 1), 0)
    if not static_bias:
        r = r + pl.program_id(0) * block_rows
    ch = (r // period) % num_ch if period > 1 else r % num_ch

    bias = jnp.full((block_rows, 1), shift[0], dtype=jnp.float32)
    for k in range(1, num_ch):
        bias = jnp.where(ch == k, jnp.float32(shift[k]), bias)

    o_ref[...] = (x_ref[...].astype(jnp.float32) + bias).astype(o_ref.dtype)


def mean_shift(x, rgb_range=255.0, rgb_mean=(0.4488, 0.4371, 0.404), sign=-1,
               out_dtype=None):
    """x: (N, C, H, W) with C == len(rgb_mean). Returns x + sign*rgb_range*rgb_mean[c]."""
    n, c, h, w = x.shape
    assert c == len(rgb_mean), "channel dim must match rgb_mean length"
    out_dtype = np.dtype(x.dtype if out_dtype is None else out_dtype)
    shift = tuple(float(sign) * float(rgb_range) * float(m) for m in rgb_mean)

    rows = n * c
    if rows >= 8 or w < 128:
        # Flattened (N*C, H*W) view: channel = row % C. Lane axis is huge & dense.
        R, L, period = rows, h * w, 1
        row_align = math.lcm(c, 8)
    else:
        # Few rows (typical SR): fold H into the sublane axis so all 8 sublanes of
        # every vreg / VMEM tile carry data. channel = (row // H) % C.
        R, L, period = rows * h, w, h
        row_align = 8
    x2d = x.reshape(R, L)

    itemsize = x.dtype.itemsize
    br, bl = _choose_tiles(R, L, itemsize, row_align, _TILE_BYTES)
    grid = (pl.cdiv(R, br), pl.cdiv(L, bl))

    kernel = functools.partial(
        _mean_shift_kernel, shift=shift, period=period, block_rows=br,
        static_bias=(br % (c * period) == 0))

    # Double-buffered in+out footprint of the padded VMEM tiles, plus headroom.
    # Raising the scoped-VMEM limit matters on v5e (16 MiB default); the footprint
    # itself is kept small enough for v7x's 64 MiB physical VMEM.
    pad_elems = _round_up(br, 8) * _round_up(bl, 128)
    footprint = 2 * pad_elems * (itemsize + out_dtype.itemsize)
    vmem_limit = int(min(64 << 20, max(32 << 20, footprint + (8 << 20))))

    # Reuse x's HBM buffer for the output when dtypes match (no second full array).
    alias = {0: 0} if out_dtype == x.dtype else {}

    out2d = pl.pallas_call(
        kernel,
        out_shape=jax.ShapeDtypeStruct((R, L), out_dtype),
        grid=grid,
        in_specs=[pl.BlockSpec((br, bl), lambda i, j: (i, j))],
        out_specs=pl.BlockSpec((br, bl), lambda i, j: (i, j)),
        input_output_aliases=alias,
        compiler_params=pltpu.CompilerParams(
            dimension_semantics=("parallel", "parallel"),
            vmem_limit_bytes=vmem_limit,
        ),
    )(x2d)
    return out2d.reshape(n, c, h, w)


def _reference(x, rgb_range=255.0, rgb_mean=(0.4488, 0.4371, 0.404), sign=-1,
               out_dtype=None):
    s = sign * rgb_range * jnp.asarray(rgb_mean, dtype=jnp.float32)
    y = x.astype(jnp.float32) + s.reshape(1, len(rgb_mean), 1, 1)
    return y.astype(x.dtype if out_dtype is None else out_dtype)


if __name__ == "__main__":
    key = jax.random.PRNGKey(0)

    # 1) Small NCHW case (flat (N*C, H*W) layout; lane axis split into 2 grid steps).
    x1 = jax.random.normal(key, (2, 3, 16, 16), dtype=jnp.float32) * 255.0
    e1 = _reference(x1)
    o1 = jax.block_until_ready(mean_shift(x1))
    assert o1.shape == x1.shape and o1.dtype == x1.dtype
    assert jnp.allclose(o1, e1, atol=1e-4, rtol=1e-5)

    # 2) Few-row case: H folded into the sublane axis; the chosen row blocks straddle
    #    channel boundaries, exercising the program_id-dependent bias path.
    x2 = jax.random.normal(jax.random.PRNGKey(1), (1, 3, 48, 128),
                           dtype=jnp.float32) * 255.0
    e2 = _reference(x2)
    o2 = jax.block_until_ready(mean_shift(x2))
    assert jnp.allclose(o2, e2, atol=1e-4, rtol=1e-5)

    # 3) N*C >= 8 flat layout with a bf16 output (halved write traffic; no aliasing).
    x3 = jax.random.normal(jax.random.PRNGKey(2), (4, 3, 32, 64),
                           dtype=jnp.float32) * 255.0
    e3 = _reference(x3, out_dtype=jnp.bfloat16)
    o3 = jax.block_until_ready(mean_shift(x3, out_dtype=jnp.bfloat16))
    assert o3.dtype == jnp.bfloat16
    assert jnp.allclose(o3.astype(jnp.float32), e3.astype(jnp.float32),
                        atol=4.0, rtol=2e-2)

    print("KERNEL_OK")
</pallas_src>

<mosaic_0001>
module attributes {stable_mosaic.version = 11 : i64} {
  func.func @_mean_shift_kernel(%arg0: i32, %arg1: i32, %arg2: memref<6x128xf32, #tpu.memory_space<vmem>>, %arg3: memref<6x128xf32, #tpu.memory_space<vmem>>) attributes {dimension_semantics = [#tpu.dimension_semantics<parallel>, #tpu.dimension_semantics<parallel>], iteration_bounds = array<i64: 1, 2>, scalar_prefetch = 0 : i64, scratch_operands = 0 : i64, tpu.core_type = #tpu.core_type<tc>, window_params = [{transform_indices = @transform_0, window_bounds = array<i64: 6, 128>}, {transform_indices = @transform_1, window_bounds = array<i64: 6, 128>}]} {
    %0 = tpu.iota {dimensions = array<i32: 0>} : vector<6x1xi32>
    %c3_i32 = arith.constant 3 : i32
    %c0_i32 = arith.constant 0 : i32
    %1 = arith.cmpi eq, %c3_i32, %c0_i32 : i32
    %c1_i32 = arith.constant 1 : i32
    %2 = arith.select %1, %c1_i32, %c3_i32 : i32
    %3 = vector.broadcast %2 : i32 to vector<6x1xi32>
    %4 = arith.remsi %0, %3 : vector<6x1xi32>
    %c0_i32_0 = arith.constant 0 : i32
    %5 = vector.broadcast %c0_i32_0 : i32 to vector<6x1xi32>
    %6 = arith.cmpi ne, %4, %5 : vector<6x1xi32>
    %c0_i32_1 = arith.constant 0 : i32
    %7 = vector.broadcast %c0_i32_1 : i32 to vector<6x1xi32>
    %8 = arith.cmpi slt, %4, %7 : vector<6x1xi32>
    %c0_i32_2 = arith.constant 0 : i32
    %9 = arith.cmpi slt, %2, %c0_i32_2 : i32
    %10 = vector.broadcast %9 : i1 to vector<6x1xi1>
    %11 = vector.broadcast %10 : vector<6x1xi1> to vector<6x1xi1>
    %12 = arith.xori %8, %11 : vector<6x1xi1>
    %13 = arith.andi %12, %6 : vector<6x1xi1>
    %14 = vector.broadcast %2 : i32 to vector<6x1xi32>
    %15 = arith.addi %4, %14 : vector<6x1xi32>
    %16 = arith.select %13, %15, %4 : vector<6x1xi1>, vector<6x1xi32>
    %cst = arith.constant -1.144440e+02 : f32
    %17 = vector.broadcast %cst : f32 to vector<6x1xf32>
    %c1_i32_3 = arith.constant 1 : i32
    %18 = vector.broadcast %c1_i32_3 : i32 to vector<6x1xi32>
    %19 = arith.cmpi eq, %16, %18 : vector<6x1xi32>
    %cst_4 = arith.constant -111.460503 : f32
    %20 = vector.broadcast %cst_4 : f32 to vector<6x1xf32>
    %21 = arith.select %19, %20, %17 : vector<6x1xi1>, vector<6x1xf32>
    %c2_i32 = arith.constant 2 : i32
    %22 = vector.broadcast %c2_i32 : i32 to vector<6x1xi32>
    %23 = arith.cmpi eq, %16, %22 : vector<6x1xi32>
    %cst_5 = arith.constant -1.030200e+02 : f32
    %24 = vector.broadcast %cst_5 : f32 to vector<6x1xf32>
    %25 = arith.select %23, %24, %21 : vector<6x1xi1>, vector<6x1xf32>
    %c0 = arith.constant 0 : index
    %c0_6 = arith.constant 0 : index
    %26 = vector.load %arg2[%c0, %c0_6] : memref<6x128xf32, #tpu.memory_space<vmem>>, vector<6x128xf32>
    %27 = vector.broadcast %25 : vector<6x1xf32> to vector<6x128xf32>
    %28 = arith.addf %26, %27 : vector<6x128xf32>
    %c0_7 = arith.constant 0 : index
    %c0_8 = arith.constant 0 : index
    %29 = vector.load %arg3[%c0_7, %c0_8] : memref<6x128xf32, #tpu.memory_space<vmem>>, vector<6x128xf32>
    tpu.vector_store %arg3[%c0_7, %c0_8], %28 {strides = array<i32>} : memref<6x128xf32, #tpu.memory_space<vmem>>, vector<6x128xf32>,
    return
  }
  func.func @transform_0(%arg0: i32, %arg1: i32) -> (i32, i32) {
    %c0_i32 = arith.constant 0 : i32
    return %arg0, %arg1 : i32, i32
  }
  func.func @transform_1(%arg0: i32, %arg1: i32) -> (i32, i32) {
    %c0_i32 = arith.constant 0 : i32
    return %arg0, %arg1 : i32, i32
  }
}

</mosaic_0001>

<bundles_post_ra>
// kernel: tpu_custom_call.1
= control target key start
LH: loop header
LB: loop body
LE: loop exit
PB: predicated region body
PF: predicated region fallthrough
CT: control target
= control target key end

     0   :  { %6 = vsyncpa [#allocation3], 0  ;;  %s654_s0 = inlined_call_operand.hbm [shape: f32[6,256], index: 0, kind: input, shape index: {}, may-alias: {0,1}]   ;;  %s655_s1 = inlined_call_operand.hbm [shape: f32[6,256], index: 1, kind: output, shape index: {}, may-alias: {0,1}]  }
   0x1   :  { %8 = vsyncpa [#allocation3 + $0x1], 0 }
   0x2   :  { %9 = vsyncpa [#allocation4], 0 }
   0x3   :  { %11 = vsyncpa [#allocation4 + $0x1], 0  ;;  %s478_s6 = smov 0   ;;  %s480_s7 = smov 0  }
   0x4   :  { %s482_s8 = smov 0   ;;  %s484_s9 = smov 0  }
   0x5   :  { %s486_s10 = smov 0   ;;  %s488_s11 = smov 0  }
   0x6 LB: > { %s273_s12 = sadd.s32 4294967295, %s463_s11   ;;  %s274_s13 = sadd.s32 4294967294, %s463_s11   ;;  %s463_s11 = sphi %s488_s11, %s17_s11   ;;  %s459_s10 = sphi %s486_s10, %s671_s10   ;;  %s455_s9 = sphi %s484_s9, %s670_s9   ;;  %s451_s8 = sphi %s482_s8, %s669_s8   ;;  %s447_s7 = sphi %s480_s7, %s668_s7   ;;  %s443_s6 = sphi %s478_s6, %s667_s6  }
   0x7   : > { %s26_s14 = sadd.s32 1, %s459_s10  ;;  %s38_s15 = sadd.s32 1, %s451_s8 }
   0x8   : > { %p27_p0 = scmp.ge.s32.totalorder %s26_s14, 2  ;;  %p45_p1 = scmp.ne.s32.totalorder %s451_s8, %s447_s7 }
   0x9   : > { %p46_p2 = scmp.eq.s32.totalorder %s463_s11, 0  ;;  %p51_p3 = scmp.ne.s32.totalorder %s447_s7, %s443_s6 }
   0xa   : > { %s673_s14 = smov (%p27_p0, %s26_s14), 0  ;;  %p52_p5 = scmp.eq.s32.totalorder %s273_s12, 0 }
   0xb   : > { %p519_p4 = por %p46_p2, %p45_p1  ;;  %s34_s17 = ssub.s32 %s459_s10, %s673_s14 }
   0xc   : > { %p77_p6 = scmp.eq.s32.totalorder %s273_s12, 1  ;;  %p36_p7 = scmp.eq.s32.totalorder %s34_s17, 0 }
   0xd   : > { %p525_p8 = por %p52_p5, %p51_p3  ;;  %p83_p10 = scmp.eq.s32.totalorder %s274_s13, 1 }
   0xe   : > { %p529_p9 = por %p77_p6, %p45_p1  ;;  %p300_p13 = scmp.lt.s32.totalorder %s463_s11, 2 }
   0xf   : > { %s534_s20 = scalar_select %p36_p7, %s451_s8, %s38_s15  }
  0x10   : > { %s659_s19 = scalar_select %p529_p9, 1, 0 }
  0x11   : > { %p536_p11 = por %p83_p10, %p51_p3  ;;  %s103_s22 = sand.u32 1, %s451_s8  }
  0x12   : > { %s277_s23 = sshll.u32 %s103_s22, 3  ;;  %s278_s24 = sshll.u32 %s459_s10, 7 }
  0x13   : > { %s660_s21 = scalar_select %p536_p11, 1, 0 }
  0x14   : > { %s547_s27 = scalar_lea.hbm %s654_s0, %s278_s24  ;;  %s107_s28 = scalar_lea.vmem [#allocation2], %s277_s23 }
  0x15   : > { %s116_s29 = sshll.u32 %s107_s28, 4  ;;  %p553_p0 = pnand %p300_p13, %p519_p4  ;;  %s549_s29 = int_to_ptr.vmem [resolvable:$true] %s116_s29 }
  0x16   : > { %s104_s2 = scalar_lea.sflag [#allocation3], %s103_s22  ;;  %s351_s3 = scalar_lea.hbm %s547_s27, 128 }
  0x17   : > { %p352_p3 = scmp.ne.s32.totalorder %s547_s27, %s351_s3  ;;  %p353_p5 = pneg %p553_p0 }
  0x18   : > { %s356_s12 = scalar_lea.hbm %s654_s0, 256  ;;  %p357_p4 = scmp.lt.u32.totalorder %s547_s27, %s654_s0 }
  0x19   : > { %p354_p6 = pnand %p353_p5, %p352_p3  ;;  %p358_p10 = scmp.lt.u32.totalorder %s356_s12, %s351_s3 }
  0x1a   : > { %p360_p12 = scmp.lt.u32.totalorder %s351_s3, %s547_s27 }
  0x1b   : > { %p355_p7 = pneg %p354_p6  ;;  %p359_p13 = por %p358_p10, %p357_p4 }
  0x1d   : > { %p361_p1 = por %p360_p12, %p359_p13 }
  0x1f   : > { %p362_p2 = pnand %p361_p1, %p355_p7 }
  0x21   : > { %365 = shalt.err (!%p362_p2)
}
  0x22   : > { %s366_s16 = scalar_lea.vmem %s549_s29, 128  ;;  %s465_s17 = smov [#allocation2]  }
  0x23   : > { %p367_p3 = scmp.ne.s32.totalorder %s549_s29, %s366_s16  ;;  %s371_s22 = sshll.u32 %s465_s17, 4  ;;  %s372_s22 = int_to_ptr.vmem [resolvable:$false] %s371_s22 }
  0x24   : > { %s373_s23 = scalar_lea.vmem %s372_s22, 256  ;;  %p374_p9 = scmp.lt.s32.totalorder %s549_s29, %s372_s22 }
  0x25   : > { %p369_p6 = pnand %p367_p3, %p353_p5  ;;  %p375_p4 = scmp.lt.s32.totalorder %s373_s23, %s366_s16 }
  0x27   : > { %p370_p11 = pneg %p369_p6  ;;  %p376_p10 = por %p375_p4, %p374_p9 }
  0x29   : > { %p377_p12 = pnand %p376_p10, %p370_p11 }
  0x2b   : > { %380 = shalt.err (!%p377_p12)
}
  0x2c   : > { %295 = dma.hbm_to_vmem [thread:$0]  (!%p553_p0), %s547_s27, 128, %s549_s29, %s104_s2  }
  0x2d   : > { %p662_p1 = scmp.lt.s32.totalorder %s463_s11, 3  ;;  %p663_p2 = scmp.ge.s32.totalorder %s463_s11, 1 }
  0x2f   : > { %p122_p5 = pnand %p663_p2, %p662_p1 }
  0x30   : > { %s589_s24 = sand.u32 (!%p122_p5), 1, %s447_s7  }
  0x31   : > { %125 = sbr.rel (%p122_p5) target bundleno = 91 (0x5b), region = 24  ;;  %s280_s25 = sshll.u32 (!%p122_p5), %s589_s24, 3 }
  0x32   : > { %s128_s26 = scalar_lea.sflag (!%p122_p5), [#allocation3], %s589_s24  ;;  %s131_s28 = scalar_lea.vmem (!%p122_p5), [#allocation2], %s280_s25 }
  0x38   : > { %434 = dma.done.wait (%p525_p8), %s128_s26, 128  }
  0x39   : > { %436 = vsyncadd (%p525_p8), %s128_s26, 4294967168  ;;  %v150_v0 = vlaneseq  ;;  %v172_v9 = vld [vmem:[%s131_s28] sm:$0x3f]  ;;  %s149_s18 = scalar_lea.vmem [#allocation5], %s280_s25  ;;  %s283_s29 = sshll.u32 %s455_s9, 7 }
  0x3a   : > { %s191_s27 = sshll.u32 %s149_s18, 4  ;;  %v466_v10 = vmov -114.444   ;;  %s607_s3 = scalar_lea.hbm %s655_s1, %s283_s29  ;;  %s602_s27 = int_to_ptr.vmem [resolvable:$true] %s191_s27 }
  0x3b   : > { %v151_v1 = vshrl.u32 %v150_v0, 7  ;;  %s176_s4 = scalar_lea.sflag [#allocation4], %s589_s24  ;;  %s381_s5 = scalar_lea.vmem %s602_s27, 128 }
  0x3c   : > { %p382_p8 = scmp.ne.s32.totalorder %s602_s27, %s381_s5  ;;  %p664_p9 = scmp.ne.s32.totalorder %s659_s19, 0 }
  0x3d   : > { %v597_v2 = vmul.u32.u64.low 2863311531, %v151_v1  ;;  %v598_v3 = vmul.u32.u64.high 2863311531, %v151_v1, %v597_v2  ;;  %s467_s9 = smov [#allocation5]  }
  0x3e   : > { %p383_p11 = pnand %p382_p8, %p664_p9  ;;  %s385_s12 = sshll.u32 %s467_s9, 4  ;;  %s386_s12 = int_to_ptr.vmem [resolvable:$false] %s385_s12 }
  0x3f   : > { %v158_v4 = vshrl.u32 %v598_v3, 1  ;;  %s387_s13 = scalar_lea.vmem %s386_s12, 256  ;;  %p388_p7 = scmp.lt.s32.totalorder %s602_s27, %s386_s12 }
  0x40   : > { %p384_p0 = pneg %p383_p11  ;;  %p389_p13 = scmp.lt.s32.totalorder %s387_s13, %s381_s5 }
  0x41   : > { %v159_v5 = vmul.u32 3, %v158_v4 }
  0x42   : > { %p390_p3 = por %p389_p13, %p388_p7 }
  0x43   : > { %v160_v6 = vsub.s32 %v151_v1, %v159_v5 }
  0x44   : > { %p391_p6 = pnand %p390_p3, %p384_p0 }
  0x45   : > { %vm163_vm0 = vcmp.ne.s32.totalorder %v160_v6, 0  ;;  %vm164_vm1 = vcmp.lt.s32.totalorder %v160_v6, 0  ;;  %v166_v7 = vadd.s32 3, %v160_v6 }
  0x46   : > { %vm165_vm2 = vmand %vm164_vm1, %vm163_vm0 }
  0x47   : > { %v167_v8 = vsel %vm165_vm2, %v166_v7, %v160_v6 }
  0x48   : > { %vm168_vm3 = vcmp.eq.s32.totalorder %v167_v8, 1  ;;  %vm170_vm4 = vcmp.eq.s32.totalorder %v167_v8, 2 }
  0x49   : > { %v169_v11 = vsel %vm168_vm3, -111.4605, %v466_v10 }
  0x4a   : > { %v171_v12 = vsel %vm170_vm4, -103.02, %v169_v11 }
  0x4b   : > { %v173_v13 = vadd.f32 %v172_v9, %v171_v12 }
  0x4d   : > { %174 = vst [vmem:[%s149_s18] sm:$0x3f] %v173_v13 }
  0x4e   : > { %394 = shalt.err (!%p391_p6)
}
  0x4f   : > { %s395_s15 = scalar_lea.hbm %s607_s3, 128  ;;  %s399_s22 = scalar_lea.hbm %s655_s1, 256 }
  0x50   : > { %p396_p4 = scmp.ne.s32.totalorder %s607_s3, %s395_s15  ;;  %p400_p1 = scmp.lt.u32.totalorder %s607_s3, %s655_s1 }
  0x51   : > { %p401_p2 = scmp.lt.u32.totalorder %s399_s22, %s395_s15  ;;  %p403_p8 = scmp.lt.u32.totalorder %s395_s15, %s607_s3 }
  0x52   : > { %p397_p10 = pnand %p396_p4, %p664_p9 }
  0x53   : > { %p402_p5 = por %p401_p2, %p400_p1 }
  0x54   : > { %p398_p12 = pneg %p397_p10 }
  0x55   : > { %p404_p11 = por %p403_p8, %p402_p5 }
  0x57   : > { %p405_p0 = pnand %p404_p11, %p398_p12 }
  0x59   : > { %408 = shalt.err (!%p405_p0)
}
  0x5a   : > { %290 = dma.vmem_to_hbm [thread:$0]  (%p664_p9), %s602_s27, 128, %s607_s3, %s176_s4  }
  0x5b PF: > { %s203_s25 = sand.u32 1, %s443_s6   ;;  %p665_p7 = scmp.ne.s32.totalorder %s660_s21, 0 }
  0x5c   : > { %p666_p13 = scmp.ge.s32.totalorder %s463_s11, 2  ;;  %s204_s26 = scalar_lea.sflag [#allocation4], %s203_s25 }
  0x5e   : > { %p297_p3 = pnand %p666_p13, %p665_p7 }
  0x60   : > { %438 = dma.done.wait (!%p297_p3), %s204_s26, 128  }
  0x61   : > { %440 = vsyncadd (!%p297_p3), %s204_s26, 4294967168  ;;  %s17_s11 = sadd.s32 1, %s463_s11   ;;  %s667_s6 = smov %s447_s7 }
  0x62   : > { %p14_p6 = scmp.ge.s32.totalorder %s17_s11, 4   ;;  %s668_s7 = smov %s451_s8 }
  0x63   : > { %s669_s8 = smov %s534_s20  ;;  %s670_s9 = smov %s459_s10 }
  0x64   : > { %s671_s10 = smov %s673_s14  ;;  %16 = sbr.rel (!%p14_p6) target bundleno = 6 (0x6), region = 69 }
  0x6b   :  { %209 = vsyncpa [#allocation3], 1 }
  0x6c   :  { %211 = vsyncpa [#allocation3 + $0x1], 1 }
  0x6d   :  { %212 = vsyncpa [#allocation4], 1 }
  0x6e   :  { %214 = vsyncpa [#allocation4 + $0x1], 1 }

</bundles_post_ra>
